<compile_context>
chip_gen: v7x
topology: tpu7x:2x2x1
jax: 0.10.0
libtpu: 0.0.40
codegen_flags: <defaults>
</compile_context>

<pallas_src>
import numpy as np

import jax
import jax.numpy as jnp
from jax import lax
from jax.experimental import pallas as pl
from jax.experimental.pallas import tpu as pltpu


# --------------------------------------------------------------------------- #
# Fused kernel: (upconv ∘ conv1 band) + bridge band -> ReLU -> conv2 band -> ReLU
# --------------------------------------------------------------------------- #
def _unet_up_block_kernel(xc_ref, wb1_ref, m2_ref, bias1_ref, b2_ref, mask_ref, o_ref):
    # xc_ref   : (Mp, Lx+Lb)    bf16  zero-separator-padded stack [x row | cropped-bridge row-pair]
    # wb1_ref  : (3, Lx+Lb, Lo) bf16  conv1 band matrices, 2x2 upconv pre-composed into the x half
    # m2_ref   : (3, Lo, Lo)    bf16  conv2 band matrices
    # bias1_ref: (Mp, Lo)       f32   b1 + upconv-bias routed through the valid conv1 taps (per row)
    # b2_ref   : (1, Lo)        f32   lane-tiled conv2 bias
    # mask_ref : (Mp, 1)        f32   1 at image rows, 0 at separator rows
    # o_ref    : (Mp, Lo)       f32   output, row-pair layout (lane-dense, Lo = 2*W*Cout = 128)
    xc = xc_ref[...]

    def band_conv(lhs, w_ref, bias):
        # out[p] = lhs[p-1] @ w[0] + lhs[p] @ w[1] + lhs[p+1] @ w[2] + bias
        # Taps run on the UNSHIFTED lhs; the +/-1-row combine happens on the f32 outputs
        # (plain f32 sublane shifts; no packed-bf16 unpack/shift/repack sequences).
        y0 = jnp.dot(lhs, w_ref[0], preferred_element_type=jnp.float32)
        y1 = jnp.dot(lhs, w_ref[1], preferred_element_type=jnp.float32)
        y2 = jnp.dot(lhs, w_ref[2], preferred_element_type=jnp.float32)
        z = jnp.zeros((1, y0.shape[1]), jnp.float32)
        y0s = jnp.concatenate([z, y0[:-1, :]], axis=0)   # tap at row p-1
        y2s = jnp.concatenate([y2[1:, :], z], axis=0)    # tap at row p+1
        return y0s + y1 + y2s + bias

    # conv1 (+ pre-composed upconv) + ReLU; separator rows re-zeroed so they act as
    # conv2's row zero-padding.
    h1 = jnp.maximum(band_conv(xc, wb1_ref, bias1_ref[...]), 0.0)
    h1 = h1 * mask_ref[...]
    h1b = h1.astype(jnp.bfloat16)

    # conv2 + ReLU.
    out = jnp.maximum(band_conv(h1b, m2_ref, b2_ref[...]), 0.0)
    # TODO(synk): emit bf16 here (and in out_shape) when the consumer accepts bf16.
    o_ref[...] = out.astype(o_ref.dtype)


# --------------------------------------------------------------------------- #
# One-time (parameter-load-time) weight repacking — pure numpy, NO per-call cost
# --------------------------------------------------------------------------- #
def _upconv_matrix_np(wt, Win):
    # wt: (Cin, Cout, 2, 2) torch ConvTranspose2d layout.
    # M[j*Cin + ci, ky*W*Cout + (2j+kx)*Cout + co] = wt[ci, co, ky, kx]; W = 2*Win.
    wt = np.asarray(wt, np.float32)
    Cin, Cout = wt.shape[0], wt.shape[1]
    W = 2 * Win
    M = np.zeros((Win * Cin, 2 * W * Cout), np.float32)
    J, CI, KY, KX, CO = np.meshgrid(np.arange(Win), np.arange(Cin), np.arange(2),
                                    np.arange(2), np.arange(Cout), indexing="ij")
    rows = (J * Cin + CI).ravel()
    cols = (KY * W * Cout + (2 * J + KX) * Cout + CO).ravel()
    M[rows, cols] = wt[CI.ravel(), CO.ravel(), KY.ravel(), KX.ravel()]
    return M


def _band_matrices_np(w, W):
    # w: (Cout, Cin, 3, 3) torch Conv2d layout ('same' padding), single channel group.
    # Returns B (3, 2*W*Cin, 2*W*Cout): out_coarse[p] = sum_d in_coarse_padded[p+d-1] @ B[d]
    # in the row-pair layout (lane index = s*W*C + w*C + c).  Width zero-padding is folded
    # into the bands; row zero-padding is provided by the zero coarse rows in the stack.
    w = np.asarray(w, np.float32)
    Cout, Cin = w.shape[0], w.shape[1]
    B = np.zeros((3, 2 * W * Cin, 2 * W * Cout), np.float32)
    DY, DX, SO, WO, CI, CO = np.meshgrid(np.arange(3), np.arange(3), np.arange(2),
                                         np.arange(W), np.arange(Cin), np.arange(Cout),
                                         indexing="ij")
    T = SO + DY - 1                 # fine input row relative to 2*coarse output row
    D = T // 2 + 1                  # coarse-row tap 0..2
    SI = T % 2                      # fine sub-row inside the tapped coarse row
    WI = WO + DX - 1
    valid = (WI >= 0) & (WI < W)
    rows = SI * W * Cin + WI * Cin + CI
    cols = SO * W * Cout + WO * Cout + CO
    B[D[valid], rows[valid], cols[valid]] = w[CO[valid], CI[valid], DY[valid], DX[valid]]
    return B


def pack_unet_up_block_params(params, batch, in_spatial):
    """Repack torch-layout UNetUpBlock params into fused band-matrix form.
    Call ONCE at parameter-load time (pure numpy); pass the result into the jitted forward."""
    wt, bt, w1, b1, w2, b2 = (np.asarray(p, np.float32) for p in params)
    N = batch
    Hin, Win = in_spatial
    Cin, Cout = wt.shape[0], wt.shape[1]
    Cb = w1.shape[1] - Cout
    assert Cb > 0, "UNetUpBlock needs bridge channels (conv1 in_channels > upconv out_channels)"
    W = 2 * Win
    Hc = Hin
    Mp = N * (Hc + 1) + 1            # leading zero row + per-image (Hc rows + 1 zero separator)
    Lo = 2 * W * Cout

    mup = _upconv_matrix_np(wt, Win)                     # (Win*Cin, Lo)
    m1u = _band_matrices_np(w1[:, :Cout], W)             # (3, Lo, Lo)        conv1, 'up' channels
    m1b = _band_matrices_np(w1[:, Cout:], W)             # (3, 2*W*Cb, Lo)    conv1, bridge channels
    m2 = _band_matrices_np(w2, W)                        # (3, Lo, Lo)
    # Pre-compose ConvTranspose2d(k=2,s=2) into conv1's 'up' half.
    g1 = np.einsum('kc,dcl->dkl', mup, m1u)              # (3, Win*Cin, Lo)
    wb1 = np.concatenate([g1, m1b], axis=1)              # (3, Win*Cin + 2*W*Cb, Lo)

    bt_row = np.tile(bt, 2 * W)
    b1_row = np.tile(b1, 2 * W)
    b2_row = np.tile(b2, 2 * W)[None, :]

    # Row-stack structure: row r is a zero separator iff r % (Hc+1) == 0.
    r = np.arange(Mp)
    valid = (r % (Hc + 1)) != 0
    v_prev = np.concatenate([[False], valid[:-1]])
    v_next = np.concatenate([valid[1:], [False]])
    # Upconv bias routed through conv1: tap d contributes only where the tapped row is a real
    # image row (the conv's zero-padding rows carry no upconv bias).
    bt_tap = np.stack([bt_row @ m1u[d] for d in range(3)], axis=0)       # (3, Lo)
    bias1 = (b1_row[None, :]
             + np.outer(v_prev.astype(np.float32), bt_tap[0])
             + np.outer(valid.astype(np.float32), bt_tap[1])
             + np.outer(v_next.astype(np.float32), bt_tap[2])).astype(np.float32)  # (Mp, Lo)
    mask = valid.astype(np.float32)[:, None]                              # (Mp, 1)

    return (jnp.asarray(wb1, jnp.bfloat16),
            jnp.asarray(m2, jnp.bfloat16),
            jnp.asarray(bias1, jnp.float32),
            jnp.asarray(b2_row, jnp.float32),
            jnp.asarray(mask, jnp.float32))


# --------------------------------------------------------------------------- #
# Wrapper: UNetUpBlock.forward(x, bridge)   (NCHW in / NCHW out)
# --------------------------------------------------------------------------- #
def unet_up_block_forward(x_nchw, bridge_nchw, packed):
    wb1, m2, bias1, b2_row, mask = packed
    N, Cin, Hin, Win = x_nchw.shape
    H, W = 2 * Hin, 2 * Win
    Hc = Hin
    Mp = N * (Hc + 1) + 1
    Lo = wb1.shape[2]
    Cout = Lo // (2 * W)
    Lx = Win * Cin
    Cb = bridge_nchw.shape[1]
    Lb = 2 * W * Cb
    assert wb1.shape[1] == Lx + Lb, "packed weights do not match x / bridge channel counts"
    assert bias1.shape == (Mp, Lo), "packed params were built for a different batch / spatial size"

    # ---- channels-last row(-pair) layouts; images stacked along rows with zero separators.
    # TODO(synk): in a full UNet keep this layout end-to-end to drop the NCHW<->NHWC passes.
    x_cl = jnp.transpose(x_nchw, (0, 2, 3, 1)).reshape(N, Hc, Lx)        # (N, Hc, Win*Cin)
    dy0 = (bridge_nchw.shape[2] - H) // 2
    dx0 = (bridge_nchw.shape[3] - W) // 2
    crop = bridge_nchw[:, :, dy0:dy0 + H, dx0:dx0 + W]                   # center_crop (NCHW)
    br_cl = jnp.transpose(crop, (0, 2, 3, 1)).reshape(N, Hc, Lb)         # row-pair layout
    cat_cl = jnp.concatenate([x_cl, br_cl], axis=2)                      # (N, Hc, Lx+Lb)
    cat_pad = jnp.pad(cat_cl, ((0, 0), (0, 1), (0, 0)))                  # trailing zero row / image
    cat_pad = cat_pad.reshape(N * (Hc + 1), Lx + Lb)
    cat_pad = jnp.concatenate([jnp.zeros((1, Lx + Lb), cat_pad.dtype), cat_pad], axis=0)
    cat_pad = cat_pad.astype(jnp.bfloat16)                               # (Mp, Lx+Lb)

    out_rp = pl.pallas_call(
        _unet_up_block_kernel,
        out_shape=jax.ShapeDtypeStruct((Mp, Lo), jnp.float32),
        grid=(1,),
        in_specs=[
            pl.BlockSpec((Mp, Lx + Lb), lambda i: (0, 0)),
            pl.BlockSpec((3, Lx + Lb, Lo), lambda i: (0, 0, 0)),
            pl.BlockSpec((3, Lo, Lo), lambda i: (0, 0, 0)),
            pl.BlockSpec((Mp, Lo), lambda i: (0, 0)),
            pl.BlockSpec((1, Lo), lambda i: (0, 0)),
            pl.BlockSpec((Mp, 1), lambda i: (0, 0)),
        ],
        out_specs=pl.BlockSpec((Mp, Lo), lambda i: (0, 0)),
        compiler_params=pltpu.CompilerParams(dimension_semantics=("arbitrary",)),
    )(cat_pad, wb1, m2, bias1, b2_row, mask)

    # Drop the leading zero row and per-image separator rows; row-pair -> NHWC -> NCHW.
    out_valid = out_rp[1:].reshape(N, Hc + 1, Lo)[:, :Hc, :]             # (N, Hc, 2*W*Cout)
    out_nhwc = out_valid.reshape(N, H, W, Cout)
    return jnp.transpose(out_nhwc, (0, 3, 1, 2))


# --------------------------------------------------------------------------- #
# Pure-JAX reference (mirrors the PyTorch forward exactly, in f32)
# --------------------------------------------------------------------------- #
def reference_forward(x, bridge, params):
    wt, bt, w1, b1, w2, b2 = params
    N, Cin, Hin, Win = x.shape
    Cout = wt.shape[1]
    up = jnp.einsum('ncij,cdkl->ndikjl', x, wt).reshape(N, Cout, 2 * Hin, 2 * Win)
    up = up + bt[None, :, None, None]
    H, W = 2 * Hin, 2 * Win
    dy = (bridge.shape[2] - H) // 2
    dx = (bridge.shape[3] - W) // 2
    crop = bridge[:, :, dy:dy + H, dx:dx + W]
    cat = jnp.concatenate([up, crop], axis=1)
    dn = ('NCHW', 'OIHW', 'NCHW')
    h = lax.conv_general_dilated(cat, w1, (1, 1), [(1, 1), (1, 1)],
                                 dimension_numbers=dn) + b1[None, :, None, None]
    h = jnp.maximum(h, 0.0)
    h = lax.conv_general_dilated(h, w2, (1, 1), [(1, 1), (1, 1)],
                                 dimension_numbers=dn) + b2[None, :, None, None]
    return jnp.maximum(h, 0.0)


if __name__ == "__main__":
    key = jax.random.PRNGKey(0)
    ks = jax.random.split(key, 8)

    # module config: UNetUpBlock(in_size=8, out_size=4, 'upconv', padding=True, batch_norm=False)
    in_size, out_size = 8, 4
    N, Hin, Win = 2, 8, 8        # x spatial; up-sampled to 16x16
    Hb, Wb = 18, 18              # bridge larger -> exercises center_crop

    x = jax.random.normal(ks[0], (N, in_size, Hin, Win), jnp.float32)
    bridge = jax.random.normal(ks[1], (N, in_size - out_size, Hb, Wb), jnp.float32)

    wt = 0.1 * jax.random.normal(ks[2], (in_size, out_size, 2, 2), jnp.float32)  # ConvTranspose2d
    bt = 0.1 * jax.random.normal(ks[3], (out_size,), jnp.float32)
    w1 = 0.1 * jax.random.normal(ks[4], (out_size, in_size, 3, 3), jnp.float32)  # Conv2d #1
    b1 = 0.1 * jax.random.normal(ks[5], (out_size,), jnp.float32)
    w2 = 0.1 * jax.random.normal(ks[6], (out_size, out_size, 3, 3), jnp.float32)  # Conv2d #2
    b2 = 0.1 * jax.random.normal(ks[7], (out_size,), jnp.float32)
    params = (wt, bt, w1, b1, w2, b2)

    # One-time weight repacking (parameter-load time), then a jitted forward.
    packed = pack_unet_up_block_params(params, batch=N, in_spatial=(Hin, Win))
    fwd = jax.jit(unet_up_block_forward)
    out = jax.block_until_ready(fwd(x, bridge, packed))

    ref = reference_forward(x, bridge, params)
    assert out.shape == ref.shape == (N, out_size, 2 * Hin, 2 * Win), (out.shape, ref.shape)
    max_err = float(jnp.max(jnp.abs(out - ref)))
    # bf16 activations / composite weights vs f32 reference -> relaxed tolerance (a real
    # tap/row-layout bug would produce O(0.5) errors, far above this threshold).
    assert jnp.allclose(out, ref, atol=5e-2, rtol=5e-2), f"max abs err {max_err}"
    print("KERNEL_OK")
</pallas_src>

<mosaic_0001>
module attributes {stable_mosaic.version = 11 : i64} {
  func.func @_unet_up_block_kernel(%arg0: i32, %arg1: memref<19x192xbf16, #tpu.memory_space<vmem>>, %arg2: memref<3x192x128xbf16, #tpu.memory_space<vmem>>, %arg3: memref<3x128x128xbf16, #tpu.memory_space<vmem>>, %arg4: memref<19x128xf32, #tpu.memory_space<vmem>>, %arg5: memref<1x128xf32, #tpu.memory_space<vmem>>, %arg6: memref<19x1xf32, #tpu.memory_space<vmem>>, %arg7: memref<19x128xf32, #tpu.memory_space<vmem>>) attributes {dimension_semantics = [#tpu.dimension_semantics<arbitrary>], iteration_bounds = array<i64: 1>, scalar_prefetch = 0 : i64, scratch_operands = 0 : i64, tpu.core_type = #tpu.core_type<tc>, window_params = [{pipeline_mode = #tpu.pipeline_mode<synchronous>, transform_indices = @transform_0, window_bounds = array<i64: 19, 192>}, {pipeline_mode = #tpu.pipeline_mode<synchronous>, transform_indices = @transform_1, window_bounds = array<i64: 3, 192, 128>}, {pipeline_mode = #tpu.pipeline_mode<synchronous>, transform_indices = @transform_2, window_bounds = array<i64: 3, 128, 128>}, {pipeline_mode = #tpu.pipeline_mode<synchronous>, transform_indices = @transform_3, window_bounds = array<i64: 19, 128>}, {pipeline_mode = #tpu.pipeline_mode<synchronous>, transform_indices = @transform_4, window_bounds = array<i64: 1, 128>}, {pipeline_mode = #tpu.pipeline_mode<synchronous>, transform_indices = @transform_5, window_bounds = array<i64: 19, 1>}, {pipeline_mode = #tpu.pipeline_mode<synchronous>, transform_indices = @transform_6, window_bounds = array<i64: 19, 128>}]} {
    %c0 = arith.constant 0 : index
    %c0_0 = arith.constant 0 : index
    %0 = vector.load %arg1[%c0, %c0_0] : memref<19x192xbf16, #tpu.memory_space<vmem>>, vector<19x192xbf16>
    %c0_1 = arith.constant 0 : index
    %c0_2 = arith.constant 0 : index
    %1 = vector.load %arg4[%c0_1, %c0_2] : memref<19x128xf32, #tpu.memory_space<vmem>>, vector<19x128xf32>
    %c0_3 = arith.constant 0 : index
    %c0_4 = arith.constant 0 : index
    %c0_5 = arith.constant 0 : index
    %2 = vector.load %arg2[%c0_3, %c0_4, %c0_5] : memref<3x192x128xbf16, #tpu.memory_space<vmem>>, vector<1x192x128xbf16>
    %3 = vector.shape_cast %2 : vector<1x192x128xbf16> to vector<192x128xbf16>
    %cst = arith.constant dense<0.000000e+00> : vector<19x128xf32>
    %4 = tpu.matmul %0, %3, %cst {dimension_numbers = #tpu.dot_dimension_numbers<[1], [0], [0], [1], [0, 0, 1, 1], [], []>} : vector<19x192xbf16>, vector<192x128xbf16>, vector<19x128xf32> -> vector<19x128xf32>
    %c1 = arith.constant 1 : index
    %c0_6 = arith.constant 0 : index
    %c0_7 = arith.constant 0 : index
    %5 = vector.load %arg2[%c1, %c0_6, %c0_7] : memref<3x192x128xbf16, #tpu.memory_space<vmem>>, vector<1x192x128xbf16>
    %6 = vector.shape_cast %5 : vector<1x192x128xbf16> to vector<192x128xbf16>
    %cst_8 = arith.constant dense<0.000000e+00> : vector<19x128xf32>
    %7 = tpu.matmul %0, %6, %cst_8 {dimension_numbers = #tpu.dot_dimension_numbers<[1], [0], [0], [1], [0, 0, 1, 1], [], []>} : vector<19x192xbf16>, vector<192x128xbf16>, vector<19x128xf32> -> vector<19x128xf32>
    %c2 = arith.constant 2 : index
    %c0_9 = arith.constant 0 : index
    %c0_10 = arith.constant 0 : index
    %8 = vector.load %arg2[%c2, %c0_9, %c0_10] : memref<3x192x128xbf16, #tpu.memory_space<vmem>>, vector<1x192x128xbf16>
    %9 = vector.shape_cast %8 : vector<1x192x128xbf16> to vector<192x128xbf16>
    %cst_11 = arith.constant dense<0.000000e+00> : vector<19x128xf32>
    %10 = tpu.matmul %0, %9, %cst_11 {dimension_numbers = #tpu.dot_dimension_numbers<[1], [0], [0], [1], [0, 0, 1, 1], [], []>} : vector<19x192xbf16>, vector<192x128xbf16>, vector<19x128xf32> -> vector<19x128xf32>
    %cst_12 = arith.constant 0.000000e+00 : f32
    %11 = vector.broadcast %cst_12 : f32 to vector<1x128xf32>
    %12 = vector.extract_strided_slice %4 {offsets = [0, 0], sizes = [18, 128], strides = [1, 1]} : vector<19x128xf32> to vector<18x128xf32>
    %13 = tpu.concatenate %11, %12 in 0 : vector<1x128xf32>, vector<18x128xf32> -> vector<19x128xf32>
    %14 = vector.extract_strided_slice %10 {offsets = [1, 0], sizes = [18, 128], strides = [1, 1]} : vector<19x128xf32> to vector<18x128xf32>
    %15 = tpu.concatenate %14, %11 in 0 : vector<18x128xf32>, vector<1x128xf32> -> vector<19x128xf32>
    %16 = arith.addf %13, %7 : vector<19x128xf32>
    %17 = arith.addf %16, %15 : vector<19x128xf32>
    %18 = arith.addf %17, %1 : vector<19x128xf32>
    %cst_13 = arith.constant 0.000000e+00 : f32
    %19 = vector.broadcast %cst_13 : f32 to vector<19x128xf32>
    %20 = arith.maximumf %18, %19 : vector<19x128xf32>
    %c0_14 = arith.constant 0 : index
    %c0_15 = arith.constant 0 : index
    %21 = vector.load %arg6[%c0_14, %c0_15] : memref<19x1xf32, #tpu.memory_space<vmem>>, vector<19x1xf32>
    %22 = vector.broadcast %21 : vector<19x1xf32> to vector<19x128xf32>
    %23 = arith.mulf %20, %22 : vector<19x128xf32>
    %24 = arith.truncf %23 : vector<19x128xf32> to vector<19x128xbf16>
    %c0_16 = arith.constant 0 : index
    %c0_17 = arith.constant 0 : index
    %25 = vector.load %arg5[%c0_16, %c0_17] : memref<1x128xf32, #tpu.memory_space<vmem>>, vector<1x128xf32>
    %c0_18 = arith.constant 0 : index
    %c0_19 = arith.constant 0 : index
    %c0_20 = arith.constant 0 : index
    %26 = vector.load %arg3[%c0_18, %c0_19, %c0_20] : memref<3x128x128xbf16, #tpu.memory_space<vmem>>, vector<1x128x128xbf16>
    %27 = vector.shape_cast %26 : vector<1x128x128xbf16> to vector<128x128xbf16>
    %cst_21 = arith.constant dense<0.000000e+00> : vector<19x128xf32>
    %28 = tpu.matmul %24, %27, %cst_21 {dimension_numbers = #tpu.dot_dimension_numbers<[1], [0], [0], [1], [0, 0, 1, 1], [], []>} : vector<19x128xbf16>, vector<128x128xbf16>, vector<19x128xf32> -> vector<19x128xf32>
    %c1_22 = arith.constant 1 : index
    %c0_23 = arith.constant 0 : index
    %c0_24 = arith.constant 0 : index
    %29 = vector.load %arg3[%c1_22, %c0_23, %c0_24] : memref<3x128x128xbf16, #tpu.memory_space<vmem>>, vector<1x128x128xbf16>
    %30 = vector.shape_cast %29 : vector<1x128x128xbf16> to vector<128x128xbf16>
    %cst_25 = arith.constant dense<0.000000e+00> : vector<19x128xf32>
    %31 = tpu.matmul %24, %30, %cst_25 {dimension_numbers = #tpu.dot_dimension_numbers<[1], [0], [0], [1], [0, 0, 1, 1], [], []>} : vector<19x128xbf16>, vector<128x128xbf16>, vector<19x128xf32> -> vector<19x128xf32>
    %c2_26 = arith.constant 2 : index
    %c0_27 = arith.constant 0 : index
    %c0_28 = arith.constant 0 : index
    %32 = vector.load %arg3[%c2_26, %c0_27, %c0_28] : memref<3x128x128xbf16, #tpu.memory_space<vmem>>, vector<1x128x128xbf16>
    %33 = vector.shape_cast %32 : vector<1x128x128xbf16> to vector<128x128xbf16>
    %cst_29 = arith.constant dense<0.000000e+00> : vector<19x128xf32>
    %34 = tpu.matmul %24, %33, %cst_29 {dimension_numbers = #tpu.dot_dimension_numbers<[1], [0], [0], [1], [0, 0, 1, 1], [], []>} : vector<19x128xbf16>, vector<128x128xbf16>, vector<19x128xf32> -> vector<19x128xf32>
    %cst_30 = arith.constant 0.000000e+00 : f32
    %35 = vector.broadcast %cst_30 : f32 to vector<1x128xf32>
    %36 = vector.extract_strided_slice %28 {offsets = [0, 0], sizes = [18, 128], strides = [1, 1]} : vector<19x128xf32> to vector<18x128xf32>
    %37 = tpu.concatenate %35, %36 in 0 : vector<1x128xf32>, vector<18x128xf32> -> vector<19x128xf32>
    %38 = vector.extract_strided_slice %34 {offsets = [1, 0], sizes = [18, 128], strides = [1, 1]} : vector<19x128xf32> to vector<18x128xf32>
    %39 = tpu.concatenate %38, %35 in 0 : vector<18x128xf32>, vector<1x128xf32> -> vector<19x128xf32>
    %40 = arith.addf %37, %31 : vector<19x128xf32>
    %41 = arith.addf %40, %39 : vector<19x128xf32>
    %42 = vector.broadcast %25 : vector<1x128xf32> to vector<19x128xf32>
    %43 = arith.addf %41, %42 : vector<19x128xf32>
    %cst_31 = arith.constant 0.000000e+00 : f32
    %44 = vector.broadcast %cst_31 : f32 to vector<19x128xf32>
    %45 = arith.maximumf %43, %44 : vector<19x128xf32>
    %c0_32 = arith.constant 0 : index
    %c0_33 = arith.constant 0 : index
    %46 = vector.load %arg7[%c0_32, %c0_33] : memref<19x128xf32, #tpu.memory_space<vmem>>, vector<19x128xf32>
    tpu.vector_store %arg7[%c0_32, %c0_33], %45 {strides = array<i32>} : memref<19x128xf32, #tpu.memory_space<vmem>>, vector<19x128xf32>,
    return
  }
  func.func @transform_0(%arg0: i32) -> (i32, i32) {
    %c0_i32 = arith.constant 0 : i32
    %c0_i32_0 = arith.constant 0 : i32
    %c0_i32_1 = arith.constant 0 : i32
    return %c0_i32, %c0_i32_0 : i32, i32
  }
  func.func @transform_1(%arg0: i32) -> (i32, i32, i32) {
    %c0_i32 = arith.constant 0 : i32
    %c0_i32_0 = arith.constant 0 : i32
    %c0_i32_1 = arith.constant 0 : i32
    %c0_i32_2 = arith.constant 0 : i32
    return %c0_i32, %c0_i32_0, %c0_i32_1 : i32, i32, i32
  }
  func.func @transform_2(%arg0: i32) -> (i32, i32, i32) {
    %c0_i32 = arith.constant 0 : i32
    %c0_i32_0 = arith.constant 0 : i32
    %c0_i32_1 = arith.constant 0 : i32
    %c0_i32_2 = arith.constant 0 : i32
    return %c0_i32, %c0_i32_0, %c0_i32_1 : i32, i32, i32
  }
  func.func @transform_3(%arg0: i32) -> (i32, i32) {
    %c0_i32 = arith.constant 0 : i32
    %c0_i32_0 = arith.constant 0 : i32
    %c0_i32_1 = arith.constant 0 : i32
    return %c0_i32, %c0_i32_0 : i32, i32
  }
  func.func @transform_4(%arg0: i32) -> (i32, i32) {
    %c0_i32 = arith.constant 0 : i32
    %c0_i32_0 = arith.constant 0 : i32
    %c0_i32_1 = arith.constant 0 : i32
    return %c0_i32, %c0_i32_0 : i32, i32
  }
  func.func @transform_5(%arg0: i32) -> (i32, i32) {
    %c0_i32 = arith.constant 0 : i32
    %c0_i32_0 = arith.constant 0 : i32
    %c0_i32_1 = arith.constant 0 : i32
    return %c0_i32, %c0_i32_0 : i32, i32
  }
  func.func @transform_6(%arg0: i32) -> (i32, i32) {
    %c0_i32 = arith.constant 0 : i32
    %c0_i32_0 = arith.constant 0 : i32
    %c0_i32_1 = arith.constant 0 : i32
    return %c0_i32, %c0_i32_0 : i32, i32
  }
}

</mosaic_0001>

<bundles_post_ra>
// kernel: unet_up_block_forward.1
= control target key start
LH: loop header
LB: loop body
LE: loop exit
PB: predicated region body
PF: predicated region fallthrough
CT: control target
= control target key end

     0   :  { %v1245_v0 = vmov 0   ;;  %vm141_vm0 = vcmask 523264   ;;  %vm489_vm1 = vcmask 1040384   ;;  %vm502_vm2 = vcmask 1046528   ;;  %s1565_s1 = inlined_call_operand.vmem [shape: bf16[3,192,128], index: 1, kind: input, shape index: {}]   ;;  %s1566_s0 = inlined_call_operand.vmem [shape: bf16[19,192], index: 0, kind: input, shape index: {}]   ;;  %s1567_s5 = inlined_call_operand.vmem [shape: f32[19,1], index: 5, kind: input, shape index: {}]   ;;  %s1568_s2 = inlined_call_operand.vmem [shape: bf16[3,128,128], index: 2, kind: input, shape index: {}]   ;;  %s1569_s3 = inlined_call_operand.vmem [shape: f32[19,128], index: 3, kind: input, shape index: {}]   ;;  %s1570_s4 = inlined_call_operand.vmem [shape: f32[1,128], index: 4, kind: input, shape index: {}]   ;;  %s1571_s6 = inlined_call_operand.vmem [shape: f32[19,128], index: 6, kind: output, shape index: {}]  }
   0x1   :  { %148 = vmatprep.subr.bf16.mxu0 %v1245_v0  ;;  %v1180_v1 = vld [vmem:[%s1565_s1] sm:$0xff]   ;;  %293 = vmatprep.subr.bf16.mxu1 %v1245_v0  ;;  %v1182_v3 = vld [vmem:[%s1565_s1 + $0x8] sm:$0xff]   ;;  %v1184_v5 = vld [vmem:[%s1565_s1 + $0x10] sm:$0xff]   ;;  %vm511_vm3 = vcmask 1041408  }
   0x2   :  { %v1181_v2 = vld [vmem:[%s1565_s1 + $0x60] sm:$0xff]   ;;  %1178 = vset.pattern.permute.xlu0 %v1245_v0  ;;  %1179 = vset.pattern.permute.xlu1 %v1245_v0  ;;  %v1183_v4 = vld [vmem:[%s1565_s1 + $0x68] sm:$0xff]   ;;  %v1185_v6 = vld [vmem:[%s1565_s1 + $0x70] sm:$0xff]  }
   0x3   :  { %149 = vmatpush1.bf16.msra.mxu0 %v1180_v1  ;;  %294 = vmatpush1.bf16.msra.mxu1 %v1181_v2  ;;  %v1186_v7 = vld [vmem:[%s1565_s1 + $0x18] sm:$0xff]   ;;  %v1188_v9 = vld [vmem:[%s1565_s1 + $0x20] sm:$0xff]   ;;  %v1190_v11 = vld [vmem:[%s1565_s1 + $0x28] sm:$0xff]  }
   0x4   :  { %150 = vmatprep.subr.bf16.mxu0 %v1245_v0  ;;  %295 = vmatprep.subr.bf16.mxu1 %v1245_v0  ;;  %v1187_v8 = vld [vmem:[%s1565_s1 + $0x78] sm:$0xff]   ;;  %v1189_v10 = vld [vmem:[%s1565_s1 + $0x80] sm:$0xff]   ;;  %v1191_v12 = vld [vmem:[%s1565_s1 + $0x88] sm:$0xff]  }
   0x5   :  { %v1192_v13 = vld [vmem:[%s1565_s1 + $0x30] sm:$0xff]   ;;  %v1341_v15 = vld [vmem:[%s1566_s0 + $0x4] ss:$8 sps:$4 sm:$0xff]   ;;  %v1194_v16 = vld [vmem:[%s1565_s1 + $0x38] sm:$0xff]  }
   0x6   :  { %v1193_v14 = vld [vmem:[%s1565_s1 + $0x90] sm:$0xff]   ;;  %952 = vmatprep.mubr.msk.bf16.mxu0 %vm141_vm0, %v1341_v15  ;;  %990 = vmatprep.mubr.msk.bf16.mxu1 %vm141_vm0, %v1341_v15  ;;  %v1195_v17 = vld [vmem:[%s1565_s1 + $0x98] sm:$0xff]   ;;  %v1196_v18 = vld [vmem:[%s1565_s1 + $0x40] sm:$0xff]  }
   0x7   :  { %151 = vmatpush1.bf16.msra.mxu0 %v1182_v3  ;;  %296 = vmatpush1.bf16.msra.mxu1 %v1183_v4  ;;  %v1197_v19 = vld [vmem:[%s1565_s1 + $0xa0] sm:$0xff]   ;;  %v1198_v20 = vld [vmem:[%s1565_s1 + $0x48] sm:$0xff]   ;;  %v1200_v23 = vld [vmem:[%s1565_s1 + $0x50] sm:$0xff]  }
   0x8   :  { %152 = vmatprep.subr.bf16.mxu0 %v1245_v0  ;;  %297 = vmatprep.subr.bf16.mxu1 %v1245_v0  ;;  %v1199_v21 = vld [vmem:[%s1565_s1 + $0xa8] sm:$0xff]   ;;  %v525_v22 = vld [vmem:[%s1567_s5] sm:$0xff]  ;;  %v527_v24 = vld [vmem:[%s1567_s5 + $0x10] sm:$0x7] }
   0x9   :  { %530 = vperm.xlu0 %1178, %v525_v22   ;;  %v1201_v25 = vld [vmem:[%s1565_s1 + $0xb0] sm:$0xff]   ;;  %v526_v26 = vld [vmem:[%s1567_s5 + $0x8] sm:$0xff]  ;;  %540 = vperm.xlu1 %1179, %v527_v24   ;;  %v1202_v27 = vld [vmem:[%s1565_s1 + $0x58] sm:$0xff]  }
   0xa   :  { %v1206_v28 = vld [vmem:[%s1565_s1 + $0xb8] sm:$0xff]   ;;  %v26_v29 = vld [vmem:[%s1566_s0 + $0x10] sm:$0x33]  ;;  %v1205_v30 = vld [vmem:[%s1566_s0] ss:$8 sps:$4 sm:$0xff]  }
   0xb   :  { %153 = vmatpush1.bf16.msra.mxu0 %v1184_v5  ;;  %298 = vmatpush1.bf16.msra.mxu1 %v1185_v6  ;;  %v1207_v31 = vld [vmem:[%s1565_s1 + $0xc0] sm:$0xff]   ;;  %v939_v32 = vcombine.high %v26_v29, %v26_v29  ;;  %v1208_v33 = vld [vmem:[%s1565_s1 + $0xc8] sm:$0xff]   ;;  %v938_v34 = vcombine.low %v26_v29, %v26_v29  ;;  %v1211_v35 = vld [vmem:[%s1565_s1 + $0xd0] sm:$0xff]  }
   0xc   :  { %154 = vmatprep.subr.bf16.mxu0 %v1245_v0  ;;  %299 = vmatprep.subr.bf16.mxu1 %v1245_v0  ;;  %v1212_v36 = vld [vmem:[%s1565_s1 + $0xd8] sm:$0xff]   ;;  %v1213_v37 = vld [vmem:[%s1565_s1 + $0xe0] sm:$0xff]   ;;  %v1214_v38 = vld [vmem:[%s1565_s1 + $0xe8] sm:$0xff]  }
   0xd   :  { %535 = vperm.xlu0 %1178, %v526_v26   ;;  %v1215_v39 = vld [vmem:[%s1565_s1 + $0xf0] sm:$0xff]   ;;  %v1216_v40 = vld [vmem:[%s1565_s1 + $0xf8] sm:$0xff]   ;;  %v1217_v41 = vld [vmem:[%s1565_s1 + $0x100] sm:$0xff]  }
   0xe   :  { %v1218_v42 = vld [vmem:[%s1565_s1 + $0x108] sm:$0xff]   ;;  %v1219_v43 = vld [vmem:[%s1565_s1 + $0x110] sm:$0xff]   ;;  %v1220_v44 = vld [vmem:[%s1565_s1 + $0x118] sm:$0xff]  }
   0xf   :  { %155 = vmatpush1.bf16.msra.mxu0 %v1186_v7  ;;  %300 = vmatpush1.bf16.msra.mxu1 %v1187_v8  ;;  %v1221_v45 = vld [vmem:[%s1568_s2] sm:$0xff]   ;;  %v1223_v47 = vld [vmem:[%s1568_s2 + $0x8] sm:$0xff]   ;;  %v1225_v49 = vld [vmem:[%s1568_s2 + $0x10] sm:$0xff]  }
  0x10   :  { %156 = vmatprep.subr.bf16.mxu0 %v1245_v0  ;;  %301 = vmatprep.subr.bf16.mxu1 %v1245_v0  ;;  %v1222_v46 = vld [vmem:[%s1568_s2 + $0x80] sm:$0xff]   ;;  %v1224_v48 = vld [vmem:[%s1568_s2 + $0x88] sm:$0xff]   ;;  %v1226_v50 = vld [vmem:[%s1568_s2 + $0x90] sm:$0xff]  }
  0x11   :  { %v1227_v51 = vld [vmem:[%s1568_s2 + $0x18] sm:$0xff]   ;;  %v1229_v53 = vld [vmem:[%s1568_s2 + $0x20] sm:$0xff]   ;;  %v1231_v55 = vld [vmem:[%s1568_s2 + $0x28] sm:$0xff]  }
  0x12   :  { %v1228_v52 = vld [vmem:[%s1568_s2 + $0x98] sm:$0xff]   ;;  %v1230_v54 = vld [vmem:[%s1568_s2 + $0xa0] sm:$0xff]   ;;  %v1232_v56 = vld [vmem:[%s1568_s2 + $0xa8] sm:$0xff]  }
  0x13   :  { %157 = vmatpush1.bf16.msra.mxu0 %v1188_v9  ;;  %302 = vmatpush1.bf16.msra.mxu1 %v1189_v10  ;;  %v1233_v57 = vld [vmem:[%s1568_s2 + $0x30] sm:$0xff]   ;;  %v1235_v59 = vld [vmem:[%s1568_s2 + $0x38] sm:$0xff]   ;;  %v1507_v61 = vld [vmem:[%s1568_s2 + $0x40] sm:$0xff]  }
  0x14   :  { %158 = vmatprep.subr.bf16.mxu0 %v1245_v0  ;;  %303 = vmatprep.subr.bf16.mxu1 %v1245_v0  ;;  %v1234_v58 = vld [vmem:[%s1568_s2 + $0xb0] sm:$0xff]   ;;  %v1236_v60 = vld [vmem:[%s1568_s2 + $0xb8] sm:$0xff]  }
  0x17   :  { %159 = vmatpush1.bf16.msra.mxu0 %v1190_v11  ;;  %304 = vmatpush1.bf16.msra.mxu1 %v1191_v12 }
  0x18   :  { %160 = vmatprep.subr.bf16.mxu0 %v1245_v0  ;;  %305 = vmatprep.subr.bf16.mxu1 %v1245_v0 }
  0x1b   :  { %161 = vmatpush1.bf16.msra.mxu0 %v1192_v13  ;;  %306 = vmatpush1.bf16.msra.mxu1 %v1193_v14 }
  0x1c   :  { %162 = vmatprep.subr.bf16.mxu0 %v1245_v0  ;;  %307 = vmatprep.subr.bf16.mxu1 %v1245_v0 }
  0x1f   :  { %163 = vmatpush1.bf16.msra.mxu0 %v1194_v16  ;;  %308 = vmatpush1.bf16.msra.mxu1 %v1195_v17 }
  0x20   :  { %164 = vmatprep.subr.bf16.mxu0 %v1245_v0  ;;  %309 = vmatprep.subr.bf16.mxu1 %v1245_v0 }
  0x23   :  { %165 = vmatpush1.bf16.msra.mxu0 %v1196_v18  ;;  %310 = vmatpush1.bf16.msra.mxu1 %v1197_v19 }
  0x24   :  { %166 = vmatprep.subr.bf16.mxu0 %v1245_v0  ;;  %311 = vmatprep.subr.bf16.mxu1 %v1245_v0 }
  0x27   :  { %167 = vmatpush1.bf16.msra.mxu0 %v1198_v20  ;;  %312 = vmatpush1.bf16.msra.mxu1 %v1199_v21 }
  0x28   :  { %168 = vmatprep.subr.bf16.mxu0 %v1245_v0  ;;  %313 = vmatprep.subr.bf16.mxu1 %v1245_v0 }
  0x2b   :  { %169 = vmatpush1.bf16.msra.mxu0 %v1200_v23  ;;  %314 = vmatpush1.bf16.msra.mxu1 %v1201_v25 }
  0x2c   :  { %170 = vmatprep.subr.bf16.mxu0 %v1245_v0  ;;  %315 = vmatprep.subr.bf16.mxu1 %v1245_v0 }
  0x2f   :  { %171 = vmatpush1.bf16.msra.mxu0 %v1202_v27  ;;  %316 = vmatpush1.bf16.msra.mxu1 %v1206_v28 }
  0x30   :  { %438 = vmatprep.subr.bf16.mxu0 %v1245_v0  ;;  %1117 = vmatprep.subr.bf16.mxu1 %v1221_v45 }
  0x32   :  { %181 = vmatmul.mubr.bf16.vlgmr.msra.gmra.mrb[0].mxu0 %v1205_v30  ;;  %326 = vmatmul.mubr.bf16.vlgmr.msra.gmra.mrb[0].mxu1 %v1205_v30 }
  0x33   :  { %439 = vmatpush1.bf16.msra.mxu0 %v1207_v31  ;;  %953 = vmatprep.mubr.msk.bf16.mxu0 %vm141_vm0, %v939_v32  ;;  %v27_v31 = vld [vmem:[%s1569_s3] sm:$0xff] }
  0x34   :  { %440 = vmatprep.subr.bf16.mxu0 %v1245_v0  ;;  %991 = vmatprep.mubr.msk.bf16.mxu1 %vm141_vm0, %v939_v32 }
  0x35   :  { %1118 = vmatpush3.bf16.msra.mxu1 %v1221_v45 }
  0x36   :  { %1119 = vmatprep.subr.bf16.mxu1 %v1223_v47 }
  0x37   :  { %441 = vmatpush1.bf16.msra.mxu0 %v1208_v33 }
  0x38   :  { %442 = vmatprep.subr.bf16.mxu0 %v1245_v0 }
  0x39   :  { %1120 = vmatpush3.bf16.msra.mxu1 %v1223_v47 }
  0x3a   :  { %189 = vmatmul.mubr.bf16.gmra.mrb[4].mxu0 %v938_v34  ;;  %334 = vmatmul.mubr.bf16.gmra.mrb[4].mxu1 %v938_v34 }
  0x3b   :  { %443 = vmatpush1.bf16.msra.mxu0 %v1211_v35  ;;  %1028 = vmatprep.mubr.msk.bf16.mxu0 %vm141_vm0, %v1341_v15 }
  0x3c   :  { %444 = vmatprep.subr.bf16.mxu0 %v1245_v0  ;;  %1121 = vmatprep.subr.bf16.mxu1 %v1225_v49 }
  0x3d   :  { %1122 = vmatpush3.bf16.msra.mxu1 %v1225_v49 }
  0x3e   :  { %1123 = vmatprep.subr.bf16.mxu1 %v1227_v51 }
  0x3f   :  { %445 = vmatpush1.bf16.msra.mxu0 %v1212_v36 }
  0x40   :  { %446 = vmatprep.subr.bf16.mxu0 %v1245_v0 }
  0x41   :  { %1124 = vmatpush3.bf16.msra.mxu1 %v1227_v51 }
  0x42   :  { %1125 = vmatprep.subr.bf16.mxu1 %v1229_v53 }
  0x43   :  { %447 = vmatpush1.bf16.msra.mxu0 %v1213_v37 }
  0x44   :  { %448 = vmatprep.subr.bf16.mxu0 %v1245_v0 }
  0x45   :  { %1126 = vmatpush3.bf16.msra.mxu1 %v1229_v53 }
  0x46   :  { %1127 = vmatprep.subr.bf16.mxu1 %v1231_v55 }
  0x47   :  { %449 = vmatpush1.bf16.msra.mxu0 %v1214_v38 }
  0x48   :  { %450 = vmatprep.subr.bf16.mxu0 %v1245_v0 }
  0x49   :  { %1128 = vmatpush3.bf16.msra.mxu1 %v1231_v55 }
  0x4a   :  { %1129 = vmatprep.subr.bf16.mxu1 %v1233_v57 }
  0x4b   :  { %451 = vmatpush1.bf16.msra.mxu0 %v1215_v39 }
  0x4c   :  { %452 = vmatprep.subr.bf16.mxu0 %v1245_v0 }
  0x4d   :  { %1130 = vmatpush3.bf16.msra.mxu1 %v1233_v57  ;;  %v1238_v57 = vld [vmem:[%s1568_s2 + $0x48] sm:$0xff]  }
  0x4e   :  { %1131 = vmatprep.subr.bf16.mxu1 %v1235_v59 }
  0x4f   :  { %453 = vmatpush1.bf16.msra.mxu0 %v1216_v40 }
  0x50   :  { %454 = vmatprep.subr.bf16.mxu0 %v1245_v0 }
  0x51   :  { %1132 = vmatpush3.bf16.msra.mxu1 %v1235_v59  ;;  %v1240_v59 = vld [vmem:[%s1568_s2 + $0x58] sm:$0xff]  }
  0x52   :  { %1137 = vmatprep.subr.bf16.mxu1 %v1507_v61 }
  0x53   :  { %455 = vmatpush1.bf16.msra.mxu0 %v1217_v41  ;;  %v28_v41 = vld [vmem:[%s1569_s3 + $0x8] sm:$0xff] }
  0x54   :  { %456 = vmatprep.subr.bf16.mxu0 %v1245_v0 }
  0x57   :  { %457 = vmatpush1.bf16.msra.mxu0 %v1218_v42  ;;  %v29_v42 = vld [vmem:[%s1569_s3 + $0x10] sm:$0x7] }
  0x58   :  { %458 = vmatprep.subr.bf16.mxu0 %v1245_v0 }
  0x5b   :  { %459 = vmatpush1.bf16.msra.mxu0 %v1219_v43 }
  0x5c   :  { %460 = vmatprep.subr.bf16.mxu0 %v1245_v0 }
  0x5f   :  { %461 = vmatpush1.bf16.msra.mxu0 %v1220_v44 }
  0x60   :  { %1157 = vmatprep.subr.bf16.mxu0 %v1222_v46 }
  0x62   :  { %471 = vmatmul.mubr.bf16.vlgmr.msra.gmra.mrb[8].mxu0 %v1205_v30 }
  0x63   :  { %1029 = vmatprep.mubr.msk.bf16.mxu0 %vm141_vm0, %v939_v32  ;;  %1158 = vmatpush3.bf16.msra.mxu0 %v1222_v46 }
  0x64   :  { %1159 = vmatprep.subr.bf16.mxu0 %v1224_v48 }
  0x67   :  { %1160 = vmatpush3.bf16.msra.mxu0 %v1224_v48 }
  0x68   :  { %1161 = vmatprep.subr.bf16.mxu0 %v1226_v50 }
  0x6a   :  { %479 = vmatmul.mubr.bf16.gmra.mrb[12].mxu0 %v938_v34 }
  0x6b   :  { %1162 = vmatpush3.bf16.msra.mxu0 %v1226_v50 }
  0x6c   :  { %1163 = vmatprep.subr.bf16.mxu0 %v1228_v52 }
  0x6f   :  { %1164 = vmatpush3.bf16.msra.mxu0 %v1228_v52 }
  0x70   :  { %1165 = vmatprep.subr.bf16.mxu0 %v1230_v54 }
  0x73   :  { %1166 = vmatpush3.bf16.msra.mxu0 %v1230_v54 }
  0x74   :  { %1167 = vmatprep.subr.bf16.mxu0 %v1232_v56 }
  0x77   :  { %1168 = vmatpush3.bf16.msra.mxu0 %v1232_v56 }
  0x78   :  { %1169 = vmatprep.subr.bf16.mxu0 %v1234_v58 }
  0x7b   :  { %1170 = vmatpush3.bf16.msra.mxu0 %v1234_v58  ;;  %v1239_v58 = vld [vmem:[%s1568_s2 + $0x50] sm:$0xff]  }
  0x7c   :  { %1171 = vmatprep.subr.bf16.mxu0 %v1236_v60 }
  0x7f   :  { %1172 = vmatpush3.bf16.msra.mxu0 %v1236_v60  ;;  %v1241_v60 = vld [vmem:[%s1568_s2 + $0x60] sm:$0xff]  }
  0x88   :  { %v531_v39 = vpop.permute.xlu0 %530  ;;  %v541_v48 = vpop.permute.xlu1 %540 }
  0x8c   :  { %v536_v51 = vpop.permute.xlu0 %535 }
 0x105   :  { %v182_v62 = vpop.f32.mrb[0].mxu0  ;;  %v327_v1 = vpop.f32.mrb[0].mxu1 }
 0x106   :  { %v490_v63 = vrot.slane %v182_v62, 7  ;;  %v184_v0 = vpop.f32.mrb[1].mxu0  ;;  %v329_v3 = vpop.f32.mrb[1].mxu1  ;;  %v1243_v62 = vld [vmem:[%s1568_s2 + $0x70] sm:$0xff]  }
 0x107   :  { %v185_v2 = vpop.f32.mrb[2].mxu0  ;;  %v330_v7 = vpop.f32.mrb[2].mxu1 }
 0x108   :  { %v491_v4 = vrot.slane %v185_v2, 7  ;;  %v187_v5 = vpop.f32.mrb[3].mxu0  ;;  %v498_v6 = vsel %vm489_vm1, 0.0, %v490_v63  ;;  %v332_v9 = vpop.f32.mrb[3].mxu1 }
 0x109   :  { %v513_v8 = vadd.f32 %v498_v6, %v327_v1 }
 0x10a   :  { %v492_v10 = vsel %vm489_vm1, %v490_v63, %v491_v4  ;;  %v1244_v63 = vld [vmem:[%s1568_s2 + $0x78] sm:$0xff]  }
 0x10b   :  { %v514_v11 = vadd.f32 %v492_v10, %v330_v7 }
 0x10d   :  { %v190_v12 = vpop.f32.mrb[4].mxu0  ;;  %v335_v14 = vpop.f32.mrb[4].mxu1 }
 0x10e   :  { %v493_v13 = vrot.slane %v190_v12, 7  ;;  %v192_v15 = vpop.f32.mrb[5].mxu0  ;;  %v337_v17 = vpop.f32.mrb[5].mxu1 }
 0x10f   :  { %v193_v16 = vpop.f32.mrb[6].mxu0  ;;  %v338_v20 = vpop.f32.mrb[6].mxu1 }
 0x110   :  { %v494_v18 = vsel %vm489_vm1, %v491_v4, %v493_v13  ;;  %v194_v19 = vpop.f32.mrb[7].mxu0  ;;  %v339_v22 = vpop.f32.mrb[7].mxu1 }
 0x111   :  { %v515_v21 = vadd.f32 %v494_v18, %v335_v14 }
 0x135   :  { %v472_v23 = vpop.f32.mrb[8].mxu0 }
 0x136   :  { %v474_v24 = vpop.f32.mrb[9].mxu0  ;;  %v503_v26 = vrot.slane %v472_v23, 1  ;;  %v1086_v23 = vld [vmem:[%s1570_s4] ss:$0 sm:$0xff] }
 0x137   :  { %v475_v25 = vpop.f32.mrb[10].mxu0 }
 0x138   :  { %v504_v27 = vrot.slane %v475_v25, 1  ;;  %v477_v28 = vpop.f32.mrb[11].mxu0 }
 0x13a   :  { %v505_v29 = vsel %vm502_vm2, %v503_v26, %v504_v27 }
 0x13b   :  { %v516_v30 = vadd.f32 %v513_v8, %v505_v29 }
 0x13d   :  { %v480_v32 = vpop.f32.mrb[12].mxu0  ;;  %v519_v35 = vadd.f32 %v516_v30, %v27_v31 }
 0x13e   :  { %v506_v33 = vrot.slane %v480_v32, 1  ;;  %v482_v34 = vpop.f32.mrb[13].mxu0 }
 0x13f   :  { %v483_v36 = vpop.f32.mrb[14].mxu0  ;;  %v522_v45 = vmax.f32 %v519_v35, 0.0 }
 0x140   :  { %v507_v37 = vsel %vm502_vm2, %v504_v27, %v506_v33  ;;  %v512_v38 = vsel %vm511_vm3, %v506_v33, 0.0  ;;  %v484_v40 = vpop.f32.mrb[15].mxu0 }
 0x141   :  { %v518_v43 = vadd.f32 %v515_v21, %v512_v38  ;;  %v517_v44 = vadd.f32 %v514_v11, %v507_v37  ;;  %v543_v52 = vmul.f32 %v531_v39, %v522_v45 }
 0x143   :  { %v520_v46 = vadd.f32 %v517_v44, %v28_v41  ;;  %v521_v47 = vadd.f32 %v518_v43, %v29_v42 }
 0x145   :  { %v523_v49 = vmax.f32 %v520_v46, 0.0  ;;  %v524_v50 = vmax.f32 %v521_v47, 0.0 }
 0x147   :  { %v544_v53 = vmul.f32 %v536_v51, %v523_v49  ;;  %v545_v54 = vmul.f32 %v541_v48, %v524_v50 }
 0x149   :  { %v546_v55 = vpack.c.bf16 %v544_v53, %v543_v52  ;;  %v547_v56 = vpack.c.bf16 %v545_v54, %v545_v54 }
 0x14b   :  { %1133 = vmatprep.mubr.bf16.mxu1 %v546_v55  ;;  %1173 = vmatprep.mubr.bf16.mxu0 %v546_v55 }
 0x14c   :  { %1134 = vmatmul.mubr.bf16.vlgmr.msra.gmra.mrb[8].mxu1 %v547_v56  ;;  %1174 = vmatmul.mubr.bf16.vlgmr.msra.gmra.mrb[16].mxu0 %v547_v56 }
 0x14d   :  { %1138 = vmatpush3.bf16.msra.mxu1 %v1507_v61  ;;  %1153 = vmatprep.mubr.bf16.mxu1 %v546_v55  ;;  %v1242_v61 = vld [vmem:[%s1568_s2 + $0x68] sm:$0xff]  }
 0x14e   :  { %1139 = vmatprep.subr.bf16.mxu1 %v1238_v57 }
 0x151   :  { %1140 = vmatpush3.bf16.msra.mxu1 %v1238_v57 }
 0x152   :  { %1141 = vmatprep.subr.bf16.mxu1 %v1239_v58 }
 0x155   :  { %1142 = vmatpush3.bf16.msra.mxu1 %v1239_v58 }
 0x156   :  { %1143 = vmatprep.subr.bf16.mxu1 %v1240_v59 }
 0x159   :  { %1144 = vmatpush3.bf16.msra.mxu1 %v1240_v59 }
 0x15a   :  { %1145 = vmatprep.subr.bf16.mxu1 %v1241_v60 }
 0x15d   :  { %1146 = vmatpush3.bf16.msra.mxu1 %v1241_v60 }
 0x15e   :  { %1147 = vmatprep.subr.bf16.mxu1 %v1242_v61 }
 0x161   :  { %1148 = vmatpush3.bf16.msra.mxu1 %v1242_v61 }
 0x162   :  { %1149 = vmatprep.subr.bf16.mxu1 %v1243_v62 }
 0x165   :  { %1150 = vmatpush3.bf16.msra.mxu1 %v1243_v62 }
 0x166   :  { %1151 = vmatprep.subr.bf16.mxu1 %v1244_v63 }
 0x169   :  { %1152 = vmatpush3.bf16.msra.mxu1 %v1244_v63 }
 0x16c   :  { %1154 = vmatmul.mubr.bf16.vlgmr.msra.gmra.mrb[12].mxu1 %v547_v56 }
 0x21f   :  { %v1135_v0 = vpop.f32.mrb[8].mxu1  ;;  %v1175_v1 = vpop.f32.mrb[16].mxu0 }
 0x220   :  { %v647_v2 = vpop.f32.mrb[9].mxu1  ;;  %v873_v3 = vpop.f32.mrb[17].mxu0  ;;  %v893_v6 = vrot.slane %v1135_v0, 7  ;;  %v905_v7 = vrot.slane %v1175_v1, 1 }
 0x221   :  { %v1136_v4 = vpop.f32.mrb[10].mxu1  ;;  %v1176_v5 = vpop.f32.mrb[18].mxu0  ;;  %v890_v10 = vrot.slane %v647_v2, 7  ;;  %v902_v11 = vrot.slane %v873_v3, 1 }
 0x222   :  { %v650_v8 = vpop.f32.mrb[11].mxu1  ;;  %v876_v9 = vpop.f32.mrb[19].mxu0  ;;  %v910_v22 = vsel %vm511_vm3, %v905_v7, 0.0 }
 0x223   :  { %v891_v12 = vrot.slane %v650_v8, 7  ;;  %v903_v13 = vrot.slane %v876_v9, 1  ;;  %v898_v21 = vsel %vm489_vm1, 0.0, %v890_v10 }
 0x225   :  { %v894_v14 = vsel %vm489_vm1, %v891_v12, %v893_v6  ;;  %v904_v15 = vsel %vm502_vm2, %v902_v11, %v903_v13  ;;  %v892_v16 = vsel %vm489_vm1, %v890_v10, %v891_v12  ;;  %v906_v17 = vsel %vm502_vm2, %v903_v13, %v905_v7 }
 0x23f   :  { %v1155_v18 = vpop.f32.mrb[12].mxu1 }
 0x240   :  { %v913_v19 = vadd.f32 %v1155_v18, %v894_v14  ;;  %v760_v20 = vpop.f32.mrb[13].mxu1 }
 0x241   :  { %v911_v24 = vadd.f32 %v898_v21, %v760_v20  ;;  %v1156_v25 = vpop.f32.mrb[14].mxu1 }
 0x242   :  { %v916_v26 = vadd.f32 %v913_v19, %v910_v22  ;;  %v763_v27 = vpop.f32.mrb[15].mxu1 }
 0x243   :  { %v914_v28 = vadd.f32 %v911_v24, %v904_v15  ;;  %v912_v29 = vadd.f32 %v892_v16, %v763_v27 }
 0x244   :  { %v925_v30 = vadd.f32 %v1086_v23, %v916_v26 }
 0x245   :  { %v923_v31 = vadd.f32 %v1086_v23, %v914_v28  ;;  %v915_v32 = vadd.f32 %v912_v29, %v906_v17 }
 0x246   :  { %v928_v33 = vmax.f32 %v925_v30, 0.0 }
 0x247   :  { %v926_v34 = vmax.f32 %v923_v31, 0.0  ;;  %v924_v35 = vadd.f32 %v1086_v23, %v915_v32 }
 0x248   :  { %931 = vst [vmem:[%s1571_s6 + $0x10] sm:$0x7] %v928_v33 }
 0x249   :  { %929 = vst [vmem:[%s1571_s6] sm:$0xff] %v926_v34  ;;  %v927_v36 = vmax.f32 %v924_v35, 0.0 }
 0x24b   :  { %930 = vst [vmem:[%s1571_s6 + $0x8] sm:$0xff] %v927_v36 }

</bundles_post_ra>
